<compile_context>
chip_gen: v7x
topology: tpu7x:2x2x1
jax: 0.10.0
libtpu: 0.0.40
codegen_flags: <defaults>
</compile_context>

<pallas_src>
import math
import functools

import jax
import jax.numpy as jnp
from jax.experimental import pallas as pl
from jax.experimental.pallas import tpu as pltpu


def _round_up(v, m):
    return (v + m - 1) // m * m


def _pair(v):
    return (v, v) if isinstance(v, int) else tuple(v)


# ---------------------------------------------------------------------------
# Kernel 1a: weight statistics -> SMEM scalars [scale a, midpoint].
# ---------------------------------------------------------------------------
def _stats_kernel(w_ref, stats_ref, acc_ref, *, symmetric, scale_mul,
                  valid_rows, valid_cols, tile_r):
    i = pl.program_id(0)

    @pl.when(i == 0)
    def _():
        acc_ref[0] = jnp.float32(0.0)
        acc_ref[1] = jnp.float32(-jnp.inf)
        acc_ref[2] = jnp.float32(jnp.inf)

    w = w_ref[...].astype(jnp.float32)
    # Padding (K -> Kq rows, O -> Op cols) is exact zeros, so it does not perturb
    # sum(|w|); the mean uses the true element count via `scale_mul`.  NOTE: any change
    # to the padding value would silently skew the quantization scale.
    acc_ref[0] += jnp.sum(jnp.abs(w))
    if not symmetric:
        rows = jax.lax.broadcasted_iota(jnp.int32, w.shape, 0) + i * tile_r
        cols = jax.lax.broadcasted_iota(jnp.int32, w.shape, 1)
        valid = (rows < valid_rows) & (cols < valid_cols)
        acc_ref[1] = jnp.maximum(acc_ref[1], jnp.max(jnp.where(valid, w, -jnp.inf)))
        acc_ref[2] = jnp.minimum(acc_ref[2], jnp.min(jnp.where(valid, w, jnp.inf)))

    @pl.when(i == pl.num_programs(0) - 1)
    def _():
        if symmetric:
            stats_ref[0] = acc_ref[0] * jnp.float32(scale_mul)   # = 0.7 * mean(|w|)
            stats_ref[1] = jnp.float32(0.0)
        else:
            stats_ref[0] = (acc_ref[1] - acc_ref[2]) * jnp.float32(0.5)
            stats_ref[1] = (acc_ref[1] + acc_ref[2]) * jnp.float32(0.5)


# ---------------------------------------------------------------------------
# Kernel 1b: ternarize a row block of wT to exact {-1, 0, +1}, emitted as int8
#            directly in the (K, Op) matmul layout.
# ---------------------------------------------------------------------------
def _ternarize_kernel(stats_ref, w_ref, q_ref, *, symmetric):
    w = w_ref[...].astype(jnp.float32)
    a = stats_ref[0]
    if symmetric:
        half = a * 0.5
        q = jnp.where(w > half, 1.0, 0.0)
        q = jnp.where(w < -half, -1.0, q)
    else:
        # Zero-padded rows/cols ternarize to sign(0 - mid) = +/-1 here; correctness
        # relies on padded K rows being sliced off and padded O columns being masked
        # or sliced off before the result is exposed.
        mid = stats_ref[1]
        q = jnp.sign(w - mid)
    # forward value of _ste_round(q) == q (already integer-valued); exact in int8.
    q_ref[...] = q.astype(q_ref.dtype)


def quantise_ternary_pallas(wT2d: jax.Array, symmetric: bool = True):
    """wT2d: (K, O) float32, K ordered as (kh, kw, cin) to match NHWC im2col.

    Returns (q (K, Op) int8 ternary, stats (2,) f32 = [a, mid]), Op = round_up(O, 128).
    For inference, call once and cache (q, stats) across forwards.
    """
    K, O = wT2d.shape
    Op = _round_up(O, 128)

    if K <= 256:
        tile_r, Kq = K, K            # single full-K block
    else:
        tile_r = 256                 # bigger row blocks -> fewer grid steps (review item)
        Kq = _round_up(K, tile_r)

    w_pad = wT2d
    if Kq != K or Op != O:
        w_pad = jnp.pad(wT2d, ((0, Kq - K), (0, Op - O)))   # exact zeros (see note above)
    nb = Kq // tile_r

    stats = pl.pallas_call(
        functools.partial(
            _stats_kernel,
            symmetric=symmetric,
            scale_mul=0.7 / float(O * K),
            valid_rows=K,
            valid_cols=O,
            tile_r=tile_r,
        ),
        out_shape=jax.ShapeDtypeStruct((2,), jnp.float32),
        grid=(nb,),
        in_specs=[pl.BlockSpec((tile_r, Op), lambda i: (i, 0))],
        out_specs=pl.BlockSpec(memory_space=pltpu.MemorySpace.SMEM),
        scratch_shapes=[pltpu.SMEM((3,), jnp.float32)],
        compiler_params=pltpu.CompilerParams(dimension_semantics=("arbitrary",)),
    )(w_pad)

    q = pl.pallas_call(
        functools.partial(_ternarize_kernel, symmetric=symmetric),
        out_shape=jax.ShapeDtypeStruct((Kq, Op), jnp.int8),
        grid=(nb,),
        in_specs=[
            pl.BlockSpec(memory_space=pltpu.MemorySpace.SMEM),   # stats scalars
            pl.BlockSpec((tile_r, Op), lambda i: (i, 0)),
        ],
        out_specs=pl.BlockSpec((tile_r, Op), lambda i: (i, 0)),
        compiler_params=pltpu.CompilerParams(dimension_semantics=("parallel",)),
    )(stats, w_pad)

    if Kq != K:
        q = q[:K]   # tiny slice; drops padded K rows (which are +/-1 in the asymmetric rule)
    return q, stats


# ---------------------------------------------------------------------------
# Kernel 2: tiled bf16 x int8 -> f32 MXU matmul; scale (+ bias) in the epilogue.
# ---------------------------------------------------------------------------
def _conv_matmul_kernel(s_ref, p_ref, w_ref, *rest, has_bias, single_k, mask_k,
                        k_valid, tile_k):
    if has_bias:
        b_ref, rest = rest[0], rest[1:]
    else:
        b_ref = None
    o_ref = rest[0]
    acc_ref = None if single_k else rest[1]

    p = p_ref[...]                                        # (tile_m, tile_k) bf16 patches
    if mask_k:
        # Ragged last K block: zero the out-of-range columns instead of jnp.pad-ing the
        # whole patch matrix in HBM.  For non-final K blocks this select is a no-op.
        col = jax.lax.broadcasted_iota(jnp.int32, p.shape, 1) + pl.program_id(2) * tile_k
        p = jnp.where(col < k_valid, p, jnp.zeros_like(p))
    w = w_ref[...].astype(p.dtype)                        # int8 ternary -> bf16 (VPU, hidden under MXU)
    part = jnp.dot(p, w, preferred_element_type=jnp.float32)

    def _epilogue(acc):
        out = acc * s_ref[0]                              # quantization scale a (SMEM scalar)
        if has_bias:
            out = out + b_ref[...].astype(jnp.float32)
        # NOTE: ragged last M tile reads unspecified rows; rows are independent and the
        # invalid output rows are masked on store -- keep the epilogue row-local.
        o_ref[...] = out.astype(o_ref.dtype)

    if single_k:
        _epilogue(part)                                   # no f32 accumulator round trip
    else:
        k = pl.program_id(2)

        @pl.when(k == 0)
        def _():
            acc_ref[...] = jnp.zeros_like(acc_ref)

        acc_ref[...] += part

        @pl.when(k == pl.num_programs(2) - 1)
        def _():
            _epilogue(acc_ref[...])


def _ternary_conv_matmul(patches, q, stats, bias, out_channels, out_dtype,
                         tile_k_override=None):
    """patches (M, K) bf16, q (K, Op) int8 ternary, stats (2,) f32, bias (O,)|None."""
    M, K = patches.shape
    Kw, Op = q.shape
    assert Kw == K
    O = out_channels

    # --- K tiling: single full-K block for typical convs; 2048-wide blocks with an f32
    #     accumulator + in-kernel masking of the ragged tail for long contractions. ---
    max_k = int(tile_k_override) if tile_k_override else 2048
    if K <= max_k:
        tile_k, n_k = K, 1
    else:
        tile_k = max_k
        assert tile_k % 128 == 0, "K tile must be lane-aligned (and a multiple of 32 for int8)"
        n_k = pl.cdiv(K, tile_k)
    single_k = n_k == 1
    mask_k = (not single_k) and (K % tile_k != 0)

    # --- M tiling: 16-multiple tiles (bf16 sublane packing), >=2 blocks when possible so
    #     both v7x TensorCores are used; ragged last tile handled by masked stores. ---
    if M >= 1024:
        tile_m = 512
    elif M >= 32:
        tile_m = min(512, _round_up((M + 1) // 2, 16))
    elif M >= 16:
        tile_m = 16
    else:
        tile_m = M
    n_m = pl.cdiv(M, tile_m)

    # --- O tiling: one lane-dense tile covering all output channels when it fits (<=512),
    #     so the big patch matrix is streamed from HBM exactly once. ---
    tile_o = min(Op, 512)
    if O >= tile_o:
        out_cols = O                      # unpadded output; ragged last O tile masked on store
        n_o = pl.cdiv(O, tile_o)
    else:
        out_cols = Op                     # O smaller than one tile: keep padded cols, slice in JAX
        n_o = 1

    has_bias = bias is not None
    in_specs = [
        pl.BlockSpec(memory_space=pltpu.MemorySpace.SMEM),            # stats [a, mid]
        pl.BlockSpec((tile_m, tile_k), lambda i, j, k: (i, k)),       # patches (bf16)
        pl.BlockSpec((tile_k, tile_o), lambda i, j, k: (k, j)),       # ternary weights (int8)
    ]
    args = [stats, patches, q]
    if has_bias:
        bias_pad = jnp.pad(bias.astype(jnp.float32),
                           (0, n_o * tile_o - O)).reshape(1, n_o * tile_o)
        in_specs.append(pl.BlockSpec((1, tile_o), lambda i, j, k: (0, j)))
        args.append(bias_pad)

    scratch = [] if single_k else [pltpu.VMEM((tile_m, tile_o), jnp.float32)]

    out = pl.pallas_call(
        functools.partial(_conv_matmul_kernel, has_bias=has_bias, single_k=single_k,
                          mask_k=mask_k, k_valid=K, tile_k=tile_k),
        out_shape=jax.ShapeDtypeStruct((M, out_cols), out_dtype),
        grid=(n_m, n_o, n_k),
        in_specs=in_specs,
        out_specs=pl.BlockSpec((tile_m, tile_o), lambda i, j, k: (i, j)),
        scratch_shapes=scratch,
        compiler_params=pltpu.CompilerParams(
            dimension_semantics=("parallel", "parallel", "arbitrary"),
            vmem_limit_bytes=32 * 1024 * 1024),   # explicit headroom (v5e's 16 MiB default)
    )(*args)

    if out_cols != O:
        out = out[:, :O]   # drop padded channels (also hides asymmetric-rule +/-1 pad columns)
    return out  # (M, O)


# ---------------------------------------------------------------------------
# im2col glue (JAX-side), NHWC-based: no transpose of the KH*KW-expanded tensor.
# TODO(synk): fuse into the matmul kernel to avoid materializing it in HBM at all.
# ---------------------------------------------------------------------------
def _im2col_nhwc(x_nhwc, kh, kw, stride, padding, dilation):
    """x_nhwc: (N, H, W, C) -> patches (N*OH*OW, KH*KW*C) with K order (kh, kw, c)."""
    n, h, w, c = x_nhwc.shape
    sh, sw = stride
    ph, pw = padding
    dh, dw = dilation
    oh = (h + 2 * ph - dh * (kh - 1) - 1) // sh + 1
    ow = (w + 2 * pw - dw * (kw - 1) - 1) // sw + 1
    x_pad = jnp.pad(x_nhwc, ((0, 0), (ph, ph), (pw, pw), (0, 0))) if (ph or pw) else x_nhwc
    cols = []
    for i in range(kh):
        for j in range(kw):
            patch = jax.lax.slice(
                x_pad,
                (0, i * dh, j * dw, 0),
                (n, i * dh + (oh - 1) * sh + 1, j * dw + (ow - 1) * sw + 1, c),
                (1, sh, sw, 1),
            )  # (n, oh, ow, c)
            cols.append(patch)
    patches = jnp.concatenate(cols, axis=-1).reshape(n * oh * ow, kh * kw * c)
    return patches, oh, ow


# ---------------------------------------------------------------------------
# Public forward.
# ---------------------------------------------------------------------------
def bitconv2d_apply(x, q, stats, bias, out_channels, kernel_size, stride, padding,
                    dilation, tile_k_override=None):
    """Apply a pre-quantized ternary conv (q, stats from quantise_ternary_pallas)."""
    KH, KW = kernel_size
    n = x.shape[0]
    # bf16 activations (cast before the small NHWC transpose); ternary weights are exact.
    x_nhwc = jnp.transpose(x.astype(jnp.bfloat16), (0, 2, 3, 1))
    patches, oh, ow = _im2col_nhwc(x_nhwc, KH, KW, stride, padding, dilation)
    out = _ternary_conv_matmul(patches, q, stats, bias, out_channels,
                               out_dtype=x.dtype, tile_k_override=tile_k_override)
    y = out.reshape(n, oh, ow, out_channels)
    return jnp.transpose(y, (0, 3, 1, 2))   # back to NCHW (module contract)


def bitconv2d_forward(
    x,
    weight,
    bias=None,
    stride=(1, 1),
    padding=(0, 0),
    dilation=(1, 1),
    groups=1,
    symmetric=True,
    tile_k_override=None,
):
    """BitConv2d.forward.  x: (N, Cin, H, W) NCHW; weight: (O, Cin, KH, KW)."""
    assert groups == 1  # TODO(synk): grouped conv not implemented in this kernel
    stride, padding, dilation = _pair(stride), _pair(padding), _pair(dilation)
    O, Cin, KH, KW = weight.shape

    # Tiny transpose of the weight so K order (kh, kw, cin) matches the NHWC im2col;
    # the ternarize kernel then writes the (K, Op) matmul layout directly.
    wT = jnp.transpose(weight.astype(jnp.float32), (2, 3, 1, 0)).reshape(KH * KW * Cin, O)
    # NOTE: for inference, hoist this call out of the hot path and cache (q, stats).
    q, stats = quantise_ternary_pallas(wT, symmetric=symmetric)

    return bitconv2d_apply(x, q, stats, bias, O, (KH, KW), stride, padding, dilation,
                           tile_k_override=tile_k_override)


# ---------------------------------------------------------------------------
# Pure-JAX reference for validation (same math as the PyTorch module).
# ---------------------------------------------------------------------------
def _reference_forward(x, weight, bias, stride, padding, dilation, symmetric=True):
    w = weight.astype(jnp.float32)
    if symmetric:
        a = jnp.mean(jnp.abs(w)) * 0.7
        q = jnp.where(w > a / 2, 1.0, 0.0)
        q = jnp.where(w < -a / 2, -1.0, q)
    else:
        mx, mn = jnp.max(w), jnp.min(w)
        a = (mx - mn) / 2
        q = jnp.sign(w - (mx + mn) / 2)
    w_hat = q * a
    y = jax.lax.conv_general_dilated(
        x.astype(jnp.float32),
        w_hat,
        window_strides=stride,
        padding=[(padding[0], padding[0]), (padding[1], padding[1])],
        rhs_dilation=dilation,
        dimension_numbers=("NCHW", "OIHW", "NCHW"),
    )
    if bias is not None:
        y = y + bias.reshape(1, -1, 1, 1)
    return y


if __name__ == "__main__":
    key = jax.random.PRNGKey(0)
    k_x, k_w, k_b, k_x2, k_w4, k_x4 = jax.random.split(key, 6)

    # Shapes consistent with the module (small).
    N, Cin, H, W = 2, 4, 16, 16
    Cout, KH, KW = 8, 3, 3
    stride, padding, dilation = (1, 1), (1, 1), (1, 1)

    x = jax.random.normal(k_x, (N, Cin, H, W), dtype=jnp.float32)

    # kaiming_uniform_(a=sqrt(5)) -> uniform(-1/sqrt(fan_in), 1/sqrt(fan_in))
    fan_in = Cin * KH * KW
    bound = 1.0 / math.sqrt(fan_in)
    weight = jax.random.uniform(
        k_w, (Cout, Cin, KH, KW), minval=-bound, maxval=bound, dtype=jnp.float32
    )

    tol = dict(atol=3e-2, rtol=3e-2)  # bf16 activations vs f32 reference

    # --- Test 1: module defaults (symmetric, bias=False) --------------------
    y = jax.block_until_ready(bitconv2d_forward(x, weight, None, stride, padding, dilation))
    y_ref = _reference_forward(x, weight, None, stride, padding, dilation)
    assert y.shape == (N, Cout, H, W), y.shape
    assert jnp.allclose(y, y_ref, **tol), float(jnp.max(jnp.abs(y - y_ref)))

    # --- Test 2: bias + odd spatial size (exercises ragged M tile) ----------
    H2 = W2 = 15
    x2 = jax.random.normal(k_x2, (N, Cin, H2, W2), dtype=jnp.float32)
    bias = jax.random.uniform(k_b, (Cout,), minval=-bound, maxval=bound, dtype=jnp.float32)
    y2 = jax.block_until_ready(bitconv2d_forward(x2, weight, bias, stride, padding, dilation))
    y2_ref = _reference_forward(x2, weight, bias, stride, padding, dilation)
    assert y2.shape == (N, Cout, H2, W2), y2.shape
    assert jnp.allclose(y2, y2_ref, **tol), float(jnp.max(jnp.abs(y2 - y2_ref)))

    # --- Test 3: asymmetric quantization branch -----------------------------
    y3 = jax.block_until_ready(
        bitconv2d_forward(x, weight, None, stride, padding, dilation, symmetric=False))
    y3_ref = _reference_forward(x, weight, None, stride, padding, dilation, symmetric=False)
    assert jnp.allclose(y3, y3_ref, **tol), float(jnp.max(jnp.abs(y3 - y3_ref)))

    # --- Test 4: K-tiled accumulator path with ragged K (forced small tile_k) ----
    Cin4, Cout4, H4 = 32, 16, 8
    x4 = jax.random.normal(k_x4, (N, Cin4, H4, H4), dtype=jnp.float32)
    bound4 = 1.0 / math.sqrt(Cin4 * KH * KW)
    w4 = jax.random.uniform(
        k_w4, (Cout4, Cin4, KH, KW), minval=-bound4, maxval=bound4, dtype=jnp.float32
    )
    y4 = jax.block_until_ready(
        bitconv2d_forward(x4, w4, None, stride, padding, dilation, tile_k_override=128))
    y4_ref = _reference_forward(x4, w4, None, stride, padding, dilation)
    assert y4.shape == (N, Cout4, H4, H4), y4.shape
    assert jnp.allclose(y4, y4_ref, **tol), float(jnp.max(jnp.abs(y4 - y4_ref)))

    print("KERNEL_OK")
</pallas_src>

<mosaic_0001>
module attributes {stable_mosaic.version = 11 : i64} {
  func.func @_stats_kernel(%arg0: i32, %arg1: memref<36x128xf32, #tpu.memory_space<vmem>>, %arg2: memref<2xf32, #tpu.memory_space<smem>>, %arg3: memref<3xf32, #tpu.memory_space<smem>>) attributes {dimension_semantics = [#tpu.dimension_semantics<arbitrary>], iteration_bounds = array<i64: 1>, scalar_prefetch = 0 : i64, scratch_operands = 1 : i64, tpu.core_type = #tpu.core_type<tc>, window_params = [{transform_indices = @transform_0, window_bounds = array<i64: 36, 128>}, {transform_indices = @transform_1, window_bounds = array<i64: 2>}]} {
    %c0_i32 = arith.constant 0 : i32
    %0 = arith.cmpi eq, %arg0, %c0_i32 : i32
    %1 = arith.extui %0 : i1 to i32
    %c0_i32_0 = arith.constant 0 : i32
    %2 = arith.cmpi ne, %1, %c0_i32_0 : i32
    scf.if %2 {
      %cst_6 = arith.constant 0.000000e+00 : f32
      %c0_7 = arith.constant 0 : index
      %15 = memref.load %arg3[%c0_7] : memref<3xf32, #tpu.memory_space<smem>>
      memref.store %cst_6, %arg3[%c0_7] : memref<3xf32, #tpu.memory_space<smem>>
      %cst_8 = arith.constant 0xFF800000 : f32
      %c1 = arith.constant 1 : index
      %16 = memref.load %arg3[%c1] : memref<3xf32, #tpu.memory_space<smem>>
      memref.store %cst_8, %arg3[%c1] : memref<3xf32, #tpu.memory_space<smem>>
      %cst_9 = arith.constant 0x7F800000 : f32
      %c2 = arith.constant 2 : index
      %17 = memref.load %arg3[%c2] : memref<3xf32, #tpu.memory_space<smem>>
      memref.store %cst_9, %arg3[%c2] : memref<3xf32, #tpu.memory_space<smem>>
    } else {
    }
    %c0 = arith.constant 0 : index
    %c0_1 = arith.constant 0 : index
    %3 = vector.load %arg1[%c0, %c0_1] : memref<36x128xf32, #tpu.memory_space<vmem>>, vector<36x128xf32>
    %c0_2 = arith.constant 0 : index
    %4 = memref.load %arg3[%c0_2] : memref<3xf32, #tpu.memory_space<smem>>
    %5 = math.absf %3 : vector<36x128xf32>
    %6 = vector.shape_cast %5 : vector<36x128xf32> to vector<1x36x128xf32>
    %cst = arith.constant dense<0.000000e+00> : vector<1xf32>
    %7 = vector.multi_reduction <add>, %6, %cst [1, 2] : vector<1x36x128xf32> to vector<1xf32>
    %8 = vector.shape_cast %7 : vector<1xf32> to vector<1x1x1xf32>
    %9 = vector.extract %8[0, 0, 0] : f32 from vector<1x1x1xf32>
    %10 = arith.addf %4, %9 : f32
    %c0_3 = arith.constant 0 : index
    %11 = memref.load %arg3[%c0_3] : memref<3xf32, #tpu.memory_space<smem>>
    memref.store %10, %arg3[%c0_3] : memref<3xf32, #tpu.memory_space<smem>>
    %c0_i32_4 = arith.constant 0 : i32
    %12 = arith.cmpi eq, %arg0, %c0_i32_4 : i32
    %13 = arith.extui %12 : i1 to i32
    %c0_i32_5 = arith.constant 0 : i32
    %14 = arith.cmpi ne, %13, %c0_i32_5 : i32
    scf.if %14 {
      %c0_6 = arith.constant 0 : index
      %15 = memref.load %arg3[%c0_6] : memref<3xf32, #tpu.memory_space<smem>>
      %cst_7 = arith.constant 0.00243055564 : f32
      %16 = arith.mulf %15, %cst_7 : f32
      %c0_8 = arith.constant 0 : index
      %17 = memref.load %arg2[%c0_8] : memref<2xf32, #tpu.memory_space<smem>>
      memref.store %16, %arg2[%c0_8] : memref<2xf32, #tpu.memory_space<smem>>
      %cst_9 = arith.constant 0.000000e+00 : f32
      %c1 = arith.constant 1 : index
      %18 = memref.load %arg2[%c1] : memref<2xf32, #tpu.memory_space<smem>>
      memref.store %cst_9, %arg2[%c1] : memref<2xf32, #tpu.memory_space<smem>>
    } else {
    }
    return
  }
  func.func @transform_0(%arg0: i32) -> (i32, i32) {
    %c0_i32 = arith.constant 0 : i32
    %c0_i32_0 = arith.constant 0 : i32
    return %arg0, %c0_i32 : i32, i32
  }
  func.func @transform_1(%arg0: i32) -> i32 {
    %c0_i32 = arith.constant 0 : i32
    %c0_i32_0 = arith.constant 0 : i32
    return %c0_i32 : i32
  }
}

</mosaic_0001>

<bundles_post_ra>
// kernel: tpu_custom_call.1
= control target key start
LH: loop header
LB: loop body
LE: loop exit
PB: predicated region body
PF: predicated region fallthrough
CT: control target
= control target key end

     0   :  { %6 = vsyncpa [#allocation4], 0  ;;  %s167_s0 = inlined_call_operand.hbm [shape: f32[36,128], index: 0, kind: input, shape index: {}]   ;;  %s168_s1 = inlined_call_operand.hbm [shape: f32[2], index: 1, kind: output, shape index: {}]  }
   0x1   :  { %7 = vsyncpa [#allocation5], 0  ;;  %s128_s6 = smov [#allocation3]   ;;  %s92_s10 = scalar_lea.hbm %s167_s0, 640 }
   0x2   :  { %s13_s7 = sshll.u32 %s128_s6, 4  ;;  %p93_p0 = scmp.ne.s32.totalorder %s167_s0, %s92_s10  ;;  %s14_s7 = int_to_ptr.vmem [resolvable:$true] %s13_s7 }
   0x3   :  { %p96_p1 = scmp.lt.u32.totalorder %s92_s10, %s167_s0 }
   0x5   :  { %p98_p2 = pnand %p96_p1, %p93_p0 }
   0x7   :  { %101 = shalt.err (!%p98_p2)
}
   0x8   :  { %s102_s15 = scalar_lea.vmem %s14_s7, 640  ;;  %p107_p4 = scmp.lt.s32.totalorder %s14_s7, %s14_s7 }
   0x9   :  { %p103_p3 = scmp.ne.s32.totalorder %s14_s7, %s102_s15  ;;  %p108_p5 = scmp.lt.s32.totalorder %s102_s15, %s102_s15 }
   0xb   :  { %p109_p6 = por %p108_p5, %p107_p4 }
   0xd   :  { %p110_p7 = pnand %p109_p6, %p103_p3 }
   0xf   :  { %113 = shalt.err (!%p110_p7)
}
  0x10   :  { %s129_s16 = smov 128   ;;  %s130_s17 = smov 8  }
  0x11   :  { %19 = dma.hbm_to_vmem [thread:$0]  %s167_s0, 640, %s14_s7, [#allocation4], %s129_s16, %s129_s16, %s130_s17  }
  0x12   :  { %124 = dma.done.wait [#allocation4], 640  }
  0x13   :  { %125 = vsyncadd [#allocation4], 4294966656  ;;  %v33_v0 = vld [vmem:[#allocation3] sm:$0xff]  ;;  %v34_v1 = vld [vmem:[#allocation3 + $0x8] sm:$0xff]  ;;  %vm47_vm0 = vcmask 1043456   ;;  %s131_s0 = smov 0.0  }
  0x14   :  { %v35_v2 = vld [vmem:[#allocation3 + $0x10] sm:$0xff]  ;;  %v36_v3 = vld [vmem:[#allocation3 + $0x18] sm:$0xff]  ;;  %v37_v4 = vld [vmem:[#allocation3 + $0x20] sm:$0xf]  ;;  %v39_v5 = vand.u32 2147483647, %v33_v0 }
  0x15   :  { %v40_v6 = vand.u32 2147483647, %v34_v1  ;;  %v41_v7 = vand.u32 2147483647, %v35_v2  ;;  %v43_v8 = vand.u32 2147483647, %v37_v4 }
  0x16   :  { %v42_v9 = vand.u32 2147483647, %v36_v3  ;;  %70 = sst [smem:[#allocation6 + $0x1]] %s131_s0  ;;  %s114_s24 = scalar_lea.hbm %s168_s1, 16 }
  0x17   :  { %v44_v10 = vadd.f32 %v40_v6, %v39_v5  ;;  %v48_v12 = vsel %vm47_vm0, %v43_v8, 0.0  ;;  %p115_p8 = scmp.ne.s32.totalorder %s168_s1, %s114_s24  ;;  %p118_p9 = scmp.lt.u32.totalorder %s114_s24, %s168_s1 }
  0x19   :  { %v45_v11 = vadd.f32 %v44_v10, %v41_v7  ;;  %p120_p10 = pnand %p118_p9, %p115_p8 }
  0x1b   :  { %v46_v13 = vadd.f32 %v45_v11, %v42_v9 }
  0x1d   :  { %v49_v14 = vadd.f32 %v48_v12, %v46_v13 }
  0x1f   :  { %50 = vadd.xlane.f32.xlu0 %v49_v14 }
  0xac   :  { %v51_v15 = vpop.xlane.xlu0 %50 }
  0xad   :  { %v52_v16 = vrot.slane %v51_v15, 4 }
  0xaf   :  { %v53_v17 = vadd.f32 %v52_v16, %v51_v15 }
  0xb1   :  { %v54_v18 = vrot.slane %v53_v17, 2 }
  0xb3   :  { %v55_v19 = vadd.f32 %v54_v18, %v53_v17 }
  0xb5   :  { %v56_v20 = vrot.slane %v55_v19, 1 }
  0xb7   :  { %v57_v21 = vadd.f32 %v56_v20, %v55_v19 }
  0xb9   :  { %85 = vpush %v57_v21 }
  0xea   :  { %s86_s20 = spop %85 }
  0xeb   :  { %s66_s21 = smul.f32 0.0024305556, %s86_s20 }
  0xed   :  { %68 = sst [smem:[#allocation6]] %s66_s21 }
  0xee   :  { %123 = shalt.err (!%p120_p10)
}
  0xef   :  { %s132_s29 = smov [#allocation6]  }
  0xf0   :  { %78 = dma.smem_to_hbm %s132_s29, 16, %s168_s1, [#allocation5]  }
  0xf1   :  { %126 = dma.done.wait [#allocation5], 16  }
  0xf2   :  { %127 = vsyncadd [#allocation5], 4294967280 }
  0xf3   :  { %82 = sfence }
  0xf4   :  { %83 = vsyncpa [#allocation4], 1 }
  0xf5   :  { %84 = vsyncpa [#allocation5], 1 }

</bundles_post_ra>
